<compile_context>
chip_gen: v5e
topology: v5e:2x2
jax: 0.10.0
libtpu: 0.0.40
codegen_flags: <defaults>
</compile_context>

<pallas_src>
import functools

import jax
import jax.numpy as jnp
from jax.experimental import pallas as pl
from jax.experimental.pallas import tpu as pltpu

BN_EPS = 1e-5
VMEM_LIMIT = 48 * 1024 * 1024  # fits v7x's 64 MiB/TC; harmless headroom on v5e/v6e (128 MiB).


# ----------------------------- helpers ---------------------------------

def _round_up(x, m):
    return ((x + m - 1) // m) * m


# ----------------------------- Pallas kernels ---------------------------------

def _conv3x3_s1_kernel(*refs, relu, nres):
    """Fused 3x3 stride-1 'same' conv + folded-BN bias (+ residual) (+ ReLU), one image per step.

    The zero-padded input plane is built in a VMEM scratch (no HBM pad copy); the 9 im2col taps
    are contiguous VMEM slices, each contracted on the MXU against its (C, Cout) weight slab and
    accumulated in f32.  The (9, C, Cout) weight / bias use constant index maps -> VMEM-resident.
    """
    if nres:
        x_ref, w_ref, b_ref, r_ref, o_ref, xpad_ref = refs
    else:
        x_ref, w_ref, b_ref, o_ref, xpad_ref = refs
        r_ref = None
    _, H, W, C = x_ref.shape
    cout = o_ref.shape[-1]

    # Zero-pad the input plane into VMEM scratch (spatial "same" padding, done on-chip).
    xpad_ref[...] = jnp.zeros_like(xpad_ref)
    xpad_ref[1:H + 1, 1:W + 1, :] = x_ref[0]

    acc = jnp.zeros((H * W, cout), jnp.float32)
    for t in range(9):
        ki, kj = divmod(t, 3)
        tap = xpad_ref[ki:ki + H, kj:kj + W, :].reshape(H * W, C)
        acc = acc + jnp.dot(tap, w_ref[t], preferred_element_type=jnp.float32)

    out = acc + b_ref[...]
    if nres:
        out = out + r_ref[0].reshape(H * W, cout).astype(jnp.float32)
    if relu:
        out = jnp.maximum(out, 0.0)
    o_ref[0] = out.reshape(H, W, cout).astype(o_ref.dtype)


def _mm_kernel(a_ref, w_ref, b_ref, o_ref, *, relu):
    # out = act(A @ W + bias).  W/bias have constant index maps (VMEM-resident, full K x full N);
    # single MXU dot per M tile, no K grid axis, no accumulator scratch.
    out = jnp.dot(a_ref[...], w_ref[...], preferred_element_type=jnp.float32) + b_ref[...]
    if relu:
        out = jnp.maximum(out, 0.0)
    o_ref[...] = out.astype(o_ref.dtype)


def _maxpool_kernel(e00_ref, e01_ref, e10_ref, e11_ref, o_ref):
    # MaxPool2d(3, stride=2, padding=1) for one image.  e{di}{dj}[a, b] = xpad[2a+di, 2b+dj],
    # so every 3x3/s2 window tap is a contiguous shifted slice of one parity plane (VPU only).
    _, Ho, Wo, _ = o_ref.shape

    def win(ref, di, dj):
        return ref[0, di:di + Ho, dj:dj + Wo, :]

    m = win(e00_ref, 0, 0)                                   # (ki, kj) = (0, 0)
    for ref, di, dj in ((e01_ref, 0, 0),                      # (0, 1)
                        (e00_ref, 0, 1),                      # (0, 2)
                        (e10_ref, 0, 0),                      # (1, 0)
                        (e11_ref, 0, 0),                      # (1, 1)
                        (e10_ref, 0, 1),                      # (1, 2)
                        (e00_ref, 1, 0),                      # (2, 0)
                        (e01_ref, 1, 0),                      # (2, 1)
                        (e00_ref, 1, 1)):                     # (2, 2)
        m = jnp.maximum(m, win(ref, di, dj))
    o_ref[0] = m


def _gap_fc_kernel(x_ref, w_ref, b_ref, o_ref):
    # AdaptiveAvgPool2d((1,1)) + Linear, one image per step: f32 spatial mean, tiny MXU matmul.
    pooled = jnp.mean(x_ref[0].astype(jnp.float32), axis=0, keepdims=True)       # (1, C)
    o_ref[0] = jnp.dot(pooled.astype(jnp.bfloat16), w_ref[...],
                       preferred_element_type=jnp.float32) + b_ref[...]


# ----------------------------- Pallas wrappers ---------------------------------

def conv3x3_s1(x, p, relu=True, residual=None):
    """Fused 3x3 stride-1 conv+BN(+residual)(+ReLU); grid over batch, im2col stays in VMEM."""
    N, H, W, C = x.shape
    cout = p["cout"]
    x = x.astype(jnp.bfloat16)
    args = [x, p["w"], p["b"]]
    in_specs = [
        pl.BlockSpec((1, H, W, C), lambda n: (n, 0, 0, 0)),
        pl.BlockSpec((9, C, cout), lambda n: (0, 0, 0)),      # resident weight
        pl.BlockSpec((1, cout), lambda n: (0, 0)),            # resident bias
    ]
    nres = residual is not None
    if nres:
        args.append(residual.astype(jnp.bfloat16))
        in_specs.append(pl.BlockSpec((1, H, W, cout), lambda n: (n, 0, 0, 0)))

    flops = 2 * N * H * W * 9 * C * cout
    bytes_acc = 2 * (N * H * W * C + 9 * C * cout + (2 if nres else 1) * N * H * W * cout)

    return pl.pallas_call(
        functools.partial(_conv3x3_s1_kernel, relu=relu, nres=nres),
        out_shape=jax.ShapeDtypeStruct((N, H, W, cout), jnp.bfloat16),
        grid=(N,),
        in_specs=in_specs,
        out_specs=pl.BlockSpec((1, H, W, cout), lambda n: (n, 0, 0, 0)),
        scratch_shapes=[pltpu.VMEM((H + 2, W + 2, C), jnp.bfloat16)],
        compiler_params=pltpu.CompilerParams(
            dimension_semantics=("parallel",), vmem_limit_bytes=VMEM_LIMIT),
        cost_estimate=pl.CostEstimate(flops=int(flops), transcendentals=0,
                                      bytes_accessed=int(bytes_acc)),
    )(*args)


def matmul_fused(a, w, bias, relu, out_dtype=jnp.bfloat16):
    """out = act(a @ w + bias).  Full-K / full-N weight is VMEM-resident; grid over M tiles only."""
    M, K = a.shape
    K2, Nn = w.shape
    assert K == K2
    a = a.astype(jnp.bfloat16)

    if M >= 1024:
        TM = 512 if K <= 1152 else 256        # keep the A tile small when K is large (v7x VMEM)
    elif M >= 512:
        TM = 256                              # >= 2 parallel grid steps for v7x megacore
    else:
        TM = _round_up(M, 16)                 # bf16 packs 2 rows/sublane -> 16-row granularity
    Mp = _round_up(M, TM)
    if Mp != M:
        a = jnp.pad(a, ((0, Mp - M), (0, 0)))

    out = pl.pallas_call(
        functools.partial(_mm_kernel, relu=relu),
        out_shape=jax.ShapeDtypeStruct((Mp, Nn), out_dtype),
        grid=(Mp // TM,),
        in_specs=[pl.BlockSpec((TM, K), lambda i: (i, 0)),
                  pl.BlockSpec((K, Nn), lambda i: (0, 0)),     # resident weight (constant index)
                  pl.BlockSpec((1, Nn), lambda i: (0, 0))],    # resident bias
        out_specs=pl.BlockSpec((TM, Nn), lambda i: (i, 0)),
        compiler_params=pltpu.CompilerParams(
            dimension_semantics=("parallel",), vmem_limit_bytes=VMEM_LIMIT),
        cost_estimate=pl.CostEstimate(flops=int(2 * Mp * K * Nn), transcendentals=0,
                                      bytes_accessed=int(2 * (Mp * K + K * Nn + Mp * Nn))),
    )(a, w, bias)
    return out[:M] if Mp != M else out


def _im2col(x, kh, kw, stride, pad):
    """x: (N, H, W, C) NHWC -> (N*Ho*Wo, kh*kw*C) patches (only for conv1 / stride-2 convs)."""
    N, H, W, C = x.shape
    if pad > 0:
        x = jnp.pad(x, ((0, 0), (pad, pad), (pad, pad), (0, 0)))
    Hp, Wp = H + 2 * pad, W + 2 * pad
    Ho = (Hp - kh) // stride + 1
    Wo = (Wp - kw) // stride + 1
    cols = [x[:, i:i + stride * Ho:stride, j:j + stride * Wo:stride, :]
            for i in range(kh) for j in range(kw)]
    patches = jnp.stack(cols, axis=3)  # (N, Ho, Wo, kh*kw, C)
    return patches.reshape(N * Ho * Wo, kh * kw * C), N, Ho, Wo


def conv_bn(x, p, stride, pad, relu=True, residual=None):
    """Conv2d (no bias) + folded BatchNorm (+ residual) (+ ReLU)."""
    kh, kw, cin, cout = p["kh"], p["kw"], p["cin"], p["cout"]
    if kh == 3 and stride == 1 and pad == 1:
        return conv3x3_s1(x, p, relu=relu, residual=residual)

    assert residual is None
    if kh == 1 and kw == 1 and pad == 0:
        # 1x1 downsample: stride-2 subsample in XLA (1x traffic), then weight-resident matmul.
        xs = x[:, ::stride, ::stride, :]
        N, Ho, Wo, _ = xs.shape
        a = xs.reshape(N * Ho * Wo, cin)
    else:
        # conv1 (7x7/s2) and the three 3x3/s2 convs: XLA im2col + weight-resident matmul.
        a, N, Ho, Wo = _im2col(x, kh, kw, stride, pad)
    w2 = p["w"].reshape(kh * kw * cin, cout)
    out = matmul_fused(a, w2, p["b"], relu=relu)
    return out.reshape(N, Ho, Wo, cout)


def maxpool_3x3_s2_p1(x):
    """MaxPool2d(kernel=3, stride=2, padding=1) in NHWC.

    XLA builds 4 stride-2 parity planes of the (-inf padded) input (~1x traffic, vs the previous
    9x tap stack); the 9-tap max happens in-kernel on contiguous shifted VMEM slices.
    """
    N, H, W, C = x.shape
    Ho = (H + 2 - 3) // 2 + 1
    Wo = (W + 2 - 3) // 2 + 1
    Hp, Wp = 2 * (Ho + 1), 2 * (Wo + 1)
    xp = jnp.pad(x, ((0, 0), (1, Hp - H - 1), (1, Wp - W - 1), (0, 0)),
                 constant_values=-jnp.inf)
    planes = [xp[:, di::2, dj::2, :] for di in (0, 1) for dj in (0, 1)]  # each (N, Ho+1, Wo+1, C)

    plane_spec = pl.BlockSpec((1, Ho + 1, Wo + 1, C), lambda n: (n, 0, 0, 0))
    return pl.pallas_call(
        _maxpool_kernel,
        out_shape=jax.ShapeDtypeStruct((N, Ho, Wo, C), x.dtype),
        grid=(N,),
        in_specs=[plane_spec] * 4,
        out_specs=pl.BlockSpec((1, Ho, Wo, C), lambda n: (n, 0, 0, 0)),
        compiler_params=pltpu.CompilerParams(
            dimension_semantics=("parallel",), vmem_limit_bytes=VMEM_LIMIT),
    )(*planes)


def gap_fc(x, fc):
    """AdaptiveAvgPool2d((1,1)) + flatten + Linear(512, num_classes), fused, gridded over batch."""
    N, H, W, C = x.shape
    x3 = x.reshape(N, H * W, C)
    ncp = fc["w"].shape[1]
    out = pl.pallas_call(
        _gap_fc_kernel,
        out_shape=jax.ShapeDtypeStruct((N, 1, ncp), jnp.float32),
        grid=(N,),
        in_specs=[pl.BlockSpec((1, H * W, C), lambda n: (n, 0, 0)),
                  pl.BlockSpec((C, ncp), lambda n: (0, 0)),
                  pl.BlockSpec((1, ncp), lambda n: (0, 0))],
        out_specs=pl.BlockSpec((1, 1, ncp), lambda n: (n, 0, 0)),
        compiler_params=pltpu.CompilerParams(dimension_semantics=("parallel",)),
    )(x3, fc["w"], fc["b"])
    return out.reshape(N, ncp)[:, :fc["num_classes"]]


# ----------------------------- parameters ---------------------------------

def _init_conv_bn(key, kh, kw, cin, cout):
    """Random conv+BN params with BN folded into the weights (eval mode), kernel-ready layout."""
    k1, k2, k3, k4, k5 = jax.random.split(key, 5)
    fan_in = kh * kw * cin
    w = jax.random.normal(k1, (kh, kw, cin, cout), jnp.float32) * (2.0 / fan_in) ** 0.5
    gamma = 1.0 + 0.1 * jax.random.normal(k2, (cout,), jnp.float32)
    beta = 0.1 * jax.random.normal(k3, (cout,), jnp.float32)
    mean = 0.1 * jax.random.normal(k4, (cout,), jnp.float32)
    var = 1.0 + 0.1 * jax.random.uniform(k5, (cout,), jnp.float32)

    scale = gamma / jnp.sqrt(var + BN_EPS)
    bias = beta - mean * scale

    # Fold BN scale into the weight; layout (kh*kw, cin, cout) bf16 (no K/N zero padding needed:
    # kernels use full-dim blocks, so conv1's K=147 is fed as-is).
    w_folded = (w * scale[None, None, None, :]).reshape(kh * kw, cin, cout).astype(jnp.bfloat16)
    return {"w": w_folded, "b": bias.reshape(1, cout), "kh": kh, "kw": kw,
            "cin": cin, "cout": cout}


def make_params(key, num_channels=3, num_classes=10):
    keys = list(jax.random.split(key, 32))
    ki = iter(keys)
    params = {"conv1": _init_conv_bn(next(ki), 7, 7, num_channels, 64)}
    cfg = [(64, 64, 1), (64, 128, 2), (128, 256, 2), (256, 512, 2)]
    layers = []
    for (cin, cout, stride) in cfg:
        blocks = []
        for b_idx in range(2):
            s = stride if b_idx == 0 else 1
            in_ch = cin if b_idx == 0 else cout
            blk = {
                "stride": s,
                "conv1": _init_conv_bn(next(ki), 3, 3, in_ch, cout),
                "conv2": _init_conv_bn(next(ki), 3, 3, cout, cout),
            }
            if s != 1 or in_ch != cout:
                blk["down"] = _init_conv_bn(next(ki), 1, 1, in_ch, cout)
            blocks.append(blk)
        layers.append(blocks)
    params["layers"] = layers

    kfc1, kfc2 = jax.random.split(next(ki))
    wfc = jax.random.normal(kfc1, (512, num_classes), jnp.float32) * (1.0 / 512) ** 0.5
    bfc = 0.01 * jax.random.normal(kfc2, (num_classes,), jnp.float32)
    ncp = _round_up(num_classes, 128)   # lane-dense fc output, sliced after the kernel
    params["fc"] = {
        "w": jnp.zeros((512, ncp), jnp.float32).at[:, :num_classes].set(wfc).astype(jnp.bfloat16),
        "b": jnp.zeros((1, ncp), jnp.float32).at[0, :num_classes].set(bfc),
        "num_classes": num_classes,
    }
    return params


# ----------------------------- forward ---------------------------------

def basic_block(x, blk):
    stride = blk["stride"]
    if "down" in blk:
        identity = conv_bn(x, blk["down"], stride=stride, pad=0, relu=False)
    else:
        identity = x
    out = conv_bn(x, blk["conv1"], stride=stride, pad=1, relu=True)
    out = conv_bn(out, blk["conv2"], stride=1, pad=1, relu=True, residual=identity)
    return out


def resnet18_forward(params, x_nchw):
    # NCHW (PyTorch) -> NHWC, bf16 activations (f32 accumulation inside the kernels).
    x = jnp.transpose(x_nchw, (0, 2, 3, 1)).astype(jnp.bfloat16)
    x = conv_bn(x, params["conv1"], stride=2, pad=3, relu=True)
    x = maxpool_3x3_s2_p1(x)
    for blocks in params["layers"]:
        for blk in blocks:
            x = basic_block(x, blk)
    return gap_fc(x, params["fc"])          # (N, num_classes) f32 logits


# ----------------------------- main ---------------------------------

if __name__ == "__main__":
    num_channels, num_classes = 3, 10
    key = jax.random.PRNGKey(0)
    kp, kx = jax.random.split(key)
    params = make_params(kp, num_channels=num_channels, num_classes=num_classes)
    x = jax.random.normal(kx, (2, num_channels, 32, 32), jnp.float32)  # small NCHW input
    out = resnet18_forward(params, x)
    out = jax.block_until_ready(out)
    assert out.shape == (2, num_classes), out.shape
    assert bool(jnp.all(jnp.isfinite(out)))
    print("KERNEL_OK")
</pallas_src>

<mosaic_0001>
module attributes {stable_mosaic.version = 11 : i64} {
  func.func @_mm_kernel(%arg0: i32, %arg1: memref<256x147xbf16, #tpu.memory_space<vmem>>, %arg2: memref<147x64xbf16, #tpu.memory_space<vmem>>, %arg3: memref<1x64xf32, #tpu.memory_space<vmem>>, %arg4: memref<256x64xbf16, #tpu.memory_space<vmem>>) attributes {dimension_semantics = [#tpu.dimension_semantics<parallel>], iteration_bounds = array<i64: 2>, scalar_prefetch = 0 : i64, scratch_operands = 0 : i64, tpu.core_type = #tpu.core_type<tc>, window_params = [{transform_indices = @transform_0, window_bounds = array<i64: 256, 147>}, {pipeline_mode = #tpu.pipeline_mode<synchronous>, transform_indices = @transform_1, window_bounds = array<i64: 147, 64>}, {pipeline_mode = #tpu.pipeline_mode<synchronous>, transform_indices = @transform_2, window_bounds = array<i64: 1, 64>}, {transform_indices = @transform_3, window_bounds = array<i64: 256, 64>}]} {
    %c0 = arith.constant 0 : index
    %c0_0 = arith.constant 0 : index
    %0 = vector.load %arg1[%c0, %c0_0] : memref<256x147xbf16, #tpu.memory_space<vmem>>, vector<256x147xbf16>
    %c0_1 = arith.constant 0 : index
    %c0_2 = arith.constant 0 : index
    %1 = vector.load %arg2[%c0_1, %c0_2] : memref<147x64xbf16, #tpu.memory_space<vmem>>, vector<147x64xbf16>
    %cst = arith.constant dense<0.000000e+00> : vector<256x64xf32>
    %2 = tpu.matmul %0, %1, %cst {dimension_numbers = #tpu.dot_dimension_numbers<[1], [0], [0], [1], [0, 0, 1, 1], [], []>} : vector<256x147xbf16>, vector<147x64xbf16>, vector<256x64xf32> -> vector<256x64xf32>
    %c0_3 = arith.constant 0 : index
    %c0_4 = arith.constant 0 : index
    %3 = vector.load %arg3[%c0_3, %c0_4] : memref<1x64xf32, #tpu.memory_space<vmem>>, vector<1x64xf32>
    %4 = vector.broadcast %3 : vector<1x64xf32> to vector<256x64xf32>
    %5 = arith.addf %2, %4 : vector<256x64xf32>
    %cst_5 = arith.constant 0.000000e+00 : f32
    %6 = vector.broadcast %cst_5 : f32 to vector<256x64xf32>
    %7 = arith.maximumf %5, %6 : vector<256x64xf32>
    %8 = arith.truncf %7 : vector<256x64xf32> to vector<256x64xbf16>
    %c0_6 = arith.constant 0 : index
    %c0_7 = arith.constant 0 : index
    %9 = vector.load %arg4[%c0_6, %c0_7] : memref<256x64xbf16, #tpu.memory_space<vmem>>, vector<256x64xbf16>
    tpu.vector_store %arg4[%c0_6, %c0_7], %8 {strides = array<i32>} : memref<256x64xbf16, #tpu.memory_space<vmem>>, vector<256x64xbf16>,
    return
  }
  func.func @transform_0(%arg0: i32) -> (i32, i32) {
    %c0_i32 = arith.constant 0 : i32
    %c0_i32_0 = arith.constant 0 : i32
    return %arg0, %c0_i32 : i32, i32
  }
  func.func @transform_1(%arg0: i32) -> (i32, i32) {
    %c0_i32 = arith.constant 0 : i32
    %c0_i32_0 = arith.constant 0 : i32
    %c0_i32_1 = arith.constant 0 : i32
    return %c0_i32, %c0_i32_0 : i32, i32
  }
  func.func @transform_2(%arg0: i32) -> (i32, i32) {
    %c0_i32 = arith.constant 0 : i32
    %c0_i32_0 = arith.constant 0 : i32
    %c0_i32_1 = arith.constant 0 : i32
    return %c0_i32, %c0_i32_0 : i32, i32
  }
  func.func @transform_3(%arg0: i32) -> (i32, i32) {
    %c0_i32 = arith.constant 0 : i32
    %c0_i32_0 = arith.constant 0 : i32
    return %arg0, %c0_i32 : i32, i32
  }
}

</mosaic_0001>

<bundles_post_ra>
// kernel: tpu_custom_call.1
= control target key start
LH: loop header
LB: loop body
LE: loop exit
PB: predicated region body
PF: predicated region fallthrough
CT: control target
= control target key end

     0   :  { %s1104_s12 = smov 0   ;;  %s1346_s0 = inlined_call_operand.vmem [shape: bf16[512,147], index: 0, kind: input, shape index: {}]   ;;  %s1347_s1 = inlined_call_operand.vmem [shape: bf16[147,64], index: 1, kind: input, shape index: {}]   ;;  %s1348_s2 = inlined_call_operand.vmem [shape: f32[1,64], index: 2, kind: input, shape index: {}]   ;;  %s1349_s3 = inlined_call_operand.vmem [shape: bf16[512,64], index: 3, kind: output, shape index: {}]  }
   0x1 LB: > { %s821_s13 = sadd.s32 4294967295, %s1081_s12   ;;  %p825_p0 = scmp.ge.s32.totalorder %s1081_s12, 1  ;;  %s1081_s12 = sphi %s1104_s12, %s13_s12  }
   0x2   : > { %p139_p1 = scmp.lt.s32.totalorder %s1081_s12, 3 }
   0x4   : > { %p140_p2 = pnand %p825_p0, %p139_p1 }
   0x5   : > { %s826_s18 = sshll.u32 (!%p140_p2), %s821_s13, 5 }
   0x6   : > { %143 = sbr.rel (%p140_p2) target bundleno = 304 (0x130), region = 32  ;;  %p165_p3 = scmp.lt.s32.totalorder (!%p140_p2), %s826_s18, 63 }
   0xb   : > { %v1053_v0 = vld [vmem:[%s1347_s1 + $0x38] sm:$0xff]  ;;  %v228_v1 = vld [vmem:[%s1347_s1 + $0x48] sm:$0x3]  ;;  %vm483_vm0 = vcmask 1040384   ;;  %vm484_vm1 = vcmask 1041408   ;;  %v1052_v3 = vld [vmem:[%s1347_s1 + $0x30] sm:$0xff] }
   0xc   : > { %v414_v2 = vunpack.c.l.b16 %v228_v1  ;;  %490 = vmatpush.bf16.msra.mxu0 %v1053_v0  ;;  %1055 = vmatpush.bf16.msra.mxu2 %v1053_v0  ;;  %v1083_v4 = vmov 65535   ;;  %s1351_s18 = smov (!%p165_p3, %s826_s18), 63  ;;  %v1051_v9 = vld [vmem:[%s1347_s1 + $0x28] sm:$0xff]  ;;  %v1054_v10 = vld [vmem:[%s1347_s1 + $0x40] sm:$0xff]  ;;  %vm434_vm2 = vcmask 154624   ;;  %v1049_v18 = vld [vmem:[%s1347_s1 + $0x18] sm:$0xff] }
   0xd   : > { %v485_v5 = vsel %vm483_vm0, 4294967295, %v1083_v4  ;;  %s1013_s23 = sshll.u32 %s1351_s18, 3  ;;  %v1050_v14 = vld [vmem:[%s1347_s1 + $0x20] sm:$0xff]  ;;  %v1048_v19 = vld [vmem:[%s1347_s1 + $0x10] sm:$0xff]  ;;  %v1047_v20 = vld [vmem:[%s1347_s1 + $0x8] sm:$0xff]  ;;  %s830_s15 = sshll.u32 %s1351_s18, 2 }
   0xe   : > { %v424_v6 = vpack.c.b16 %v414_v2, %v414_v2  ;;  %v486_v7 = vsel %vm484_vm1, %v485_v5, 0  ;;  %s1133_s28 = scalar_lea.vmem %s1346_s0, %s1013_s23  ;;  %v1046_v26 = vld [vmem:[%s1347_s1] sm:$0xff]  ;;  %s1240_s19 = scalar_lea.vmem %s1349_s3, %s830_s15  ;;  %vm732_vm3 = vcmask 519168  }
   0xf   : > { %v1014_v11 = vld [vmem:[%s1133_s28 + $0x4] sm:$0xf]  ;;  %v835_v12 = vld [vmem:[%s1133_s28 + $0x8] sm:$0xf0]  ;;  %v1032_v15 = vld [vmem:[%s1133_s28 + $0x94] sm:$0xf] }
  0x10   : > { %v488_v8 = vand.u32 %v486_v7, %v424_v6  ;;  %491 = vmatpush.bf16.msra.mxu0 %v1052_v3  ;;  %1056 = vmatpush.bf16.msra.mxu2 %v1052_v3  ;;  %v838_v13 = vor.u32 %v1014_v11, %v835_v12  ;;  %v907_v16 = vld [vmem:[%s1133_s28 + $0x98] sm:$0xf0]  ;;  %v1016_v21 = vld [vmem:[%s1133_s28 + $0x14] sm:$0xf]  ;;  %v1034_v23 = vld [vmem:[%s1133_s28 + $0xa4] sm:$0xf] }
  0x11   : > { %v910_v17 = vor.u32 %v1032_v15, %v907_v16  ;;  %v843_v22 = vld [vmem:[%s1133_s28 + $0x18] sm:$0xf0]  ;;  %v915_v24 = vld [vmem:[%s1133_s28 + $0xa8] sm:$0xf0]  ;;  %v833_v27 = vld [vmem:[%s1133_s28] sm:$0xf] }
  0x12   : > { %585 = vmatpush.bf16.msra.mxu1 %v488_v8  ;;  %1063 = vmatpush.bf16.msra.mxu3 %v488_v8  ;;  %v846_v25 = vor.u32 %v1016_v21, %v843_v22  ;;  %v1015_v28 = vld [vmem:[%s1133_s28 + $0x4] sm:$0xf0]  ;;  %v897_v29 = vld [vmem:[%s1133_s28 + $0x80] sm:$0xf]  ;;  %v918_v31 = vor.u32 %v1034_v23, %v915_v24  ;;  %v1018_v34 = vld [vmem:[%s1133_s28 + $0x24] sm:$0xf] }
  0x13   : > { %v1031_v30 = vld [vmem:[%s1133_s28 + $0x84] sm:$0xf0]  ;;  %v834_v32 = vor.u32 %v1015_v28, %v833_v27  ;;  %v851_v35 = vld [vmem:[%s1133_s28 + $0x28] sm:$0xf0]  ;;  %v1036_v36 = vld [vmem:[%s1133_s28 + $0xb4] sm:$0xf] }
  0x14   : > { %492 = vmatpush.bf16.msra.mxu0 %v1051_v9  ;;  %1057 = vmatpush.bf16.msra.mxu2 %v1051_v9  ;;  %v898_v33 = vor.u32 %v1031_v30, %v897_v29  ;;  %v923_v37 = vld [vmem:[%s1133_s28 + $0xb8] sm:$0xf0]  ;;  %v854_v38 = vor.u32 %v1018_v34, %v851_v35  ;;  %v841_v39 = vld [vmem:[%s1133_s28 + $0x10] sm:$0xf]  ;;  %v1017_v40 = vld [vmem:[%s1133_s28 + $0x14] sm:$0xf0] }
  0x15   : > { %v905_v41 = vld [vmem:[%s1133_s28 + $0x90] sm:$0xf]  ;;  %v1033_v42 = vld [vmem:[%s1133_s28 + $0x94] sm:$0xf0]  ;;  %v926_v43 = vor.u32 %v1036_v36, %v923_v37  ;;  %v842_v44 = vor.u32 %v1017_v40, %v841_v39  ;;  %v1020_v46 = vld [vmem:[%s1133_s28 + $0x34] sm:$0xf] }
  0x16   : > { %586 = vmatpush.bf16.msra.mxu1 %v1054_v10  ;;  %1064 = vmatpush.bf16.msra.mxu3 %v1054_v10  ;;  %v906_v45 = vor.u32 %v1033_v42, %v905_v41  ;;  %v859_v47 = vld [vmem:[%s1133_s28 + $0x38] sm:$0xf0]  ;;  %v1038_v48 = vld [vmem:[%s1133_s28 + $0xc4] sm:$0xf]  ;;  %v931_v49 = vld [vmem:[%s1133_s28 + $0xc8] sm:$0xf0] }
  0x17   : > { %v862_v50 = vor.u32 %v1020_v46, %v859_v47  ;;  %v849_v51 = vld [vmem:[%s1133_s28 + $0x20] sm:$0xf]  ;;  %v1019_v52 = vld [vmem:[%s1133_s28 + $0x24] sm:$0xf0]  ;;  %v934_v55 = vor.u32 %v1038_v48, %v931_v49  ;;  %v1022_v58 = vld [vmem:[%s1133_s28 + $0x44] sm:$0xf] }
  0x18   : > { %493 = vmatpush.bf16.msra.mxu0 %v1050_v14  ;;  %1058 = vmatpush.bf16.msra.mxu2 %v1050_v14  ;;  %v913_v53 = vld [vmem:[%s1133_s28 + $0xa0] sm:$0xf]  ;;  %v1035_v54 = vld [vmem:[%s1133_s28 + $0xa4] sm:$0xf0]  ;;  %v850_v56 = vor.u32 %v1019_v52, %v849_v51  ;;  %v867_v59 = vld [vmem:[%s1133_s28 + $0x48] sm:$0xf0] }
  0x19   : > { %995 = vmatmul.msk.bf16.vlgmr.msra.gmra.mxu1 %vm434_vm2, %v838_v13  ;;  %1004 = vmatmul.msk.bf16.vlgmr.msra.gmra.mxu3 %vm434_vm2, %v910_v17  ;;  %v914_v57 = vor.u32 %v1035_v54, %v913_v53  ;;  %v1040_v60 = vld [vmem:[%s1133_s28 + $0xd4] sm:$0xf]  ;;  %v939_v61 = vld [vmem:[%s1133_s28 + $0xd8] sm:$0xf0]  ;;  %v870_v62 = vor.u32 %v1022_v58, %v867_v59  ;;  %v857_v63 = vld [vmem:[%s1133_s28 + $0x30] sm:$0xf] }
  0x1a   : > { %v1021_v0 = vld [vmem:[%s1133_s28 + $0x34] sm:$0xf0]  ;;  %v921_v1 = vld [vmem:[%s1133_s28 + $0xb0] sm:$0xf]  ;;  %v942_v3 = vor.u32 %v1040_v60, %v939_v61  ;;  %v1024_v6 = vld [vmem:[%s1133_s28 + $0x54] sm:$0xf] }
  0x1b   : > { %v1037_v2 = vld [vmem:[%s1133_s28 + $0xb4] sm:$0xf0]  ;;  %v858_v4 = vor.u32 %v1021_v0, %v857_v63  ;;  %v875_v7 = vld [vmem:[%s1133_s28 + $0x58] sm:$0xf0]  ;;  %v1042_v8 = vld [vmem:[%s1133_s28 + $0xe4] sm:$0xf] }
  0x1c   : > { %494 = vmatpush.bf16.msra.mxu0 %v1049_v18  ;;  %1059 = vmatpush.bf16.msra.mxu2 %v1049_v18  ;;  %v922_v5 = vor.u32 %v1037_v2, %v921_v1  ;;  %v947_v9 = vld [vmem:[%s1133_s28 + $0xe8] sm:$0xf0]  ;;  %v878_v10 = vor.u32 %v1024_v6, %v875_v7  ;;  %v865_v11 = vld [vmem:[%s1133_s28 + $0x40] sm:$0xf]  ;;  %v1023_v12 = vld [vmem:[%s1133_s28 + $0x44] sm:$0xf0] }
  0x1d   : > { %v929_v13 = vld [vmem:[%s1133_s28 + $0xc0] sm:$0xf]  ;;  %v1039_v14 = vld [vmem:[%s1133_s28 + $0xc4] sm:$0xf0]  ;;  %v950_v15 = vor.u32 %v1042_v8, %v947_v9  ;;  %v866_v16 = vor.u32 %v1023_v12, %v865_v11  ;;  %v1026_v18 = vld [vmem:[%s1133_s28 + $0x64] sm:$0xf] }
  0x1e   : > { %v930_v17 = vor.u32 %v1039_v14, %v929_v13  ;;  %v955_v21 = vld [vmem:[%s1133_s28 + $0xf8] sm:$0xf0]  ;;  %v873_v23 = vld [vmem:[%s1133_s28 + $0x50] sm:$0xf]  ;;  %v1025_v24 = vld [vmem:[%s1133_s28 + $0x54] sm:$0xf0] }
  0x1f   : > { %v874_v28 = vor.u32 %v1025_v24, %v873_v23  ;;  %v1028_v30 = vld [vmem:[%s1133_s28 + $0x74] sm:$0xf]  ;;  %v1027_v34 = vld [vmem:[%s1133_s28 + $0x64] sm:$0xf0]  ;;  %v945_v35 = vld [vmem:[%s1133_s28 + $0xe0] sm:$0xf] }
  0x20   : > { %495 = vmatpush.bf16.msra.mxu0 %v1048_v19  ;;  %1060 = vmatpush.bf16.msra.mxu2 %v1048_v19  ;;  %v883_v19 = vld [vmem:[%s1133_s28 + $0x68] sm:$0xf0]  ;;  %v1043_v36 = vld [vmem:[%s1133_s28 + $0xe4] sm:$0xf0]  ;;  %v1030_v39 = vld [vmem:[%s1133_s28 + $0x84] sm:$0xf] }
  0x21   : > { %v886_v22 = vor.u32 %v1026_v18, %v883_v19  ;;  %v899_v40 = vld [vmem:[%s1133_s28 + $0x88] sm:$0xf0]  ;;  %v889_v42 = vld [vmem:[%s1133_s28 + $0x70] sm:$0xf]  ;;  %v1045_v46 = vld [vmem:[%s1133_s28 + $0xf4] sm:$0xf0] }
  0x22   : > { %v902_v41 = vor.u32 %v1030_v39, %v899_v40  ;;  %v1233_v51 = vld [vmem:[%s1348_s2] ss:$0 sm:$0xff] }
  0x24   : > { %496 = vmatpush.bf16.msra.mxu0 %v1047_v20  ;;  %1061 = vmatpush.bf16.msra.mxu2 %v1047_v20  ;;  %v1044_v20 = vld [vmem:[%s1133_s28 + $0xf4] sm:$0xf] }
  0x25   : > { %v958_v27 = vor.u32 %v1044_v20, %v955_v21 }
  0x28   : > { %497 = vmatpush.bf16.msra.mxu0 %v1046_v26  ;;  %1062 = vmatpush.bf16.msra.mxu2 %v1046_v26  ;;  %v1041_v26 = vld [vmem:[%s1133_s28 + $0xd4] sm:$0xf0] }
  0x29   : > { %996 = vmatmul.msk.bf16.gmra.mxu1 %vm434_vm2, %v846_v25  ;;  %1005 = vmatmul.msk.bf16.gmra.mxu3 %vm434_vm2, %v918_v31  ;;  %v937_v25 = vld [vmem:[%s1133_s28 + $0xd0] sm:$0xf]  ;;  %v891_v31 = vld [vmem:[%s1133_s28 + $0x78] sm:$0xf0] }
  0x2a   : > { %v938_v29 = vor.u32 %v1041_v26, %v937_v25 }
  0x2b   : > { %498 = vmatmul.bf16.vlgmr.msra.gmra.mxu0 %v834_v32  ;;  %538 = vmatmul.bf16.vlgmr.msra.gmra.mxu2 %v898_v33  ;;  %v894_v32 = vor.u32 %v1028_v30, %v891_v31  ;;  %v881_v33 = vld [vmem:[%s1133_s28 + $0x60] sm:$0xf] }
  0x2c   : > { %v882_v37 = vor.u32 %v1027_v34, %v881_v33 }
  0x39   : > { %997 = vmatmul.msk.bf16.gmra.mxu1 %vm434_vm2, %v854_v38  ;;  %1006 = vmatmul.msk.bf16.gmra.mxu3 %vm434_vm2, %v926_v43  ;;  %v946_v38 = vor.u32 %v1043_v36, %v945_v35  ;;  %v1029_v43 = vld [vmem:[%s1133_s28 + $0x74] sm:$0xf0] }
  0x3a   : > { %v890_v47 = vor.u32 %v1029_v43, %v889_v42 }
  0x3b   : > { %503 = vmatmul.bf16.gmra.mxu0 %v842_v44  ;;  %543 = vmatmul.bf16.gmra.mxu2 %v906_v45  ;;  %v953_v45 = vld [vmem:[%s1133_s28 + $0xf0] sm:$0xf] }
  0x3c   : > { %v954_v48 = vor.u32 %v1045_v46, %v953_v45 }
  0x49   : > { %998 = vmatmul.msk.bf16.gmra.mxu1 %vm434_vm2, %v862_v50  ;;  %1007 = vmatmul.msk.bf16.gmra.mxu3 %vm434_vm2, %v934_v55 }
  0x4b   : > { %508 = vmatmul.bf16.gmra.mxu0 %v850_v56  ;;  %548 = vmatmul.bf16.gmra.mxu2 %v914_v57 }
  0x59   : > { %999 = vmatmul.msk.bf16.gmra.mxu1 %vm434_vm2, %v870_v62  ;;  %1008 = vmatmul.msk.bf16.gmra.mxu3 %vm434_vm2, %v942_v3 }
  0x5b   : > { %513 = vmatmul.bf16.gmra.mxu0 %v858_v4  ;;  %553 = vmatmul.bf16.gmra.mxu2 %v922_v5 }
  0x69   : > { %1000 = vmatmul.msk.bf16.gmra.mxu1 %vm434_vm2, %v878_v10  ;;  %1009 = vmatmul.msk.bf16.gmra.mxu3 %vm434_vm2, %v950_v15 }
  0x6b   : > { %518 = vmatmul.bf16.gmra.mxu0 %v866_v16  ;;  %558 = vmatmul.bf16.gmra.mxu2 %v930_v17 }
  0x79   : > { %1001 = vmatmul.msk.bf16.gmra.mxu1 %vm434_vm2, %v886_v22  ;;  %1010 = vmatmul.msk.bf16.gmra.mxu3 %vm434_vm2, %v958_v27 }
  0x7b   : > { %523 = vmatmul.bf16.gmra.mxu0 %v874_v28  ;;  %563 = vmatmul.bf16.gmra.mxu2 %v938_v29 }
  0x89   : > { %1002 = vmatmul.msk.bf16.gmra.mxu1 %vm434_vm2, %v894_v32 }
  0x8b   : > { %528 = vmatmul.bf16.gmra.mxu0 %v882_v37  ;;  %568 = vmatmul.bf16.gmra.mxu2 %v946_v38 }
  0x96   : > { %v588_v44 = vpop.f32.mrf.mxu1 }
  0x99   : > { %1003 = vmatmul.msk.bf16.gmra.mxu1 %vm434_vm2, %v902_v41 }
  0x9b   : > { %533 = vmatmul.bf16.gmra.mxu0 %v890_v47  ;;  %573 = vmatmul.bf16.gmra.mxu2 %v954_v48 }
  0x9c   : > { %v633_v52 = vpop.f32.mrf.mxu3 }
  0x9e   : > { %v590_v49 = vpop.f32.mrf.mxu1 }
  0xa4   : > { %v635_v62 = vpop.f32.mrf.mxu3 }
  0xa6   : > { %v593_v50 = vpop.f32.mrf.mxu1 }
  0xa8   : > { %v499_v53 = vpop.f32.mrf.mxu0 }
  0xa9   : > { %v500_v54 = vadd.f32 %v1233_v51, %v499_v53 }
  0xab   : > { %v589_v55 = vadd.f32 %v588_v44, %v500_v54 }
  0xac   : > { %v638_v7 = vpop.f32.mrf.mxu3 }
  0xad   : > { %v668_v56 = vmax.f32 %v589_v55, 0.0 }
  0xae   : > { %v595_v57 = vpop.f32.mrf.mxu1  ;;  %v1242_v59 = vpop.f32.mrf.mxu2 }
  0xaf   : > { %v700_v58 = vpack.c.bf16 %v668_v56, %v668_v56 }
  0xb0   : > { %v501_v60 = vpop.f32.mrf.mxu0 }
  0xb1   : > { %733 = vst.msk [vmem:[%s1240_s19] sm:$0xf] %vm732_vm3, %v700_v58  ;;  %v502_v61 = vadd.f32 %v1233_v51, %v501_v60 }
  0xb3   : > { %v591_v63 = vadd.f32 %v590_v49, %v502_v61 }
  0xb4   : > { %v640_v20 = vpop.f32.mrf.mxu3 }
  0xb5   : > { %v669_v0 = vmax.f32 %v591_v63, 0.0 }
  0xb6   : > { %v598_v1 = vpop.f32.mrf.mxu1  ;;  %v1247_v3 = vpop.f32.mrf.mxu2 }
  0xb7   : > { %v701_v2 = vpack.c.bf16 %v669_v0, %v669_v0 }
  0xb8   : > { %v504_v4 = vpop.f32.mrf.mxu0 }
  0xb9   : > { %734 = vst.msk [vmem:[%s1240_s19 + $0x4] sm:$0xf] %vm732_vm3, %v701_v2  ;;  %v505_v5 = vadd.f32 %v1233_v51, %v504_v4 }
  0xbb   : > { %v594_v6 = vadd.f32 %v593_v50, %v505_v5 }
  0xbc   : > { %v643_v35 = vpop.f32.mrf.mxu3 }
  0xbd   : > { %v670_v8 = vmax.f32 %v594_v6, 0.0 }
  0xbe   : > { %v600_v9 = vpop.f32.mrf.mxu1  ;;  %v544_v11 = vpop.f32.mrf.mxu2 }
  0xbf   : > { %v702_v10 = vpack.c.bf16 %v670_v8, %v670_v8  ;;  %v545_v12 = vadd.f32 %v1233_v51, %v544_v11 }
  0xc0   : > { %v506_v13 = vpop.f32.mrf.mxu0 }
  0xc1   : > { %735 = vst.msk [vmem:[%s1240_s19 + $0x8] sm:$0xf] %vm732_vm3, %v702_v10  ;;  %v507_v14 = vadd.f32 %v1233_v51, %v506_v13  ;;  %v634_v15 = vadd.f32 %v633_v52, %v545_v12 }
  0xc3   : > { %v596_v16 = vadd.f32 %v595_v57, %v507_v14  ;;  %v686_v17 = vmax.f32 %v634_v15, 0.0 }
  0xc4   : > { %v645_v50 = vpop.f32.mrf.mxu3 }
  0xc5   : > { %v671_v18 = vmax.f32 %v596_v16, 0.0  ;;  %v718_v21 = vpack.c.bf16 %v686_v17, %v686_v17 }
  0xc6   : > { %v603_v19 = vpop.f32.mrf.mxu1  ;;  %v546_v23 = vpop.f32.mrf.mxu2 }
  0xc7   : > { %v703_v22 = vpack.c.bf16 %v671_v18, %v671_v18  ;;  %751 = vst.msk [vmem:[%s1240_s19 + $0x48] sm:$0xf] %vm732_vm3, %v718_v21  ;;  %v547_v24 = vadd.f32 %v1233_v51, %v546_v23 }
  0xc8   : > { %v509_v25 = vpop.f32.mrf.mxu0 }
  0xc9   : > { %736 = vst.msk [vmem:[%s1240_s19 + $0xc] sm:$0xf] %vm732_vm3, %v703_v22  ;;  %v510_v26 = vadd.f32 %v1233_v51, %v509_v25  ;;  %v636_v27 = vadd.f32 %v635_v62, %v547_v24 }
  0xcb   : > { %v599_v28 = vadd.f32 %v598_v1, %v510_v26  ;;  %v687_v29 = vmax.f32 %v636_v27, 0.0 }
  0xcc   : > { %v648_v2 = vpop.f32.mrf.mxu3 }
  0xcd   : > { %v672_v30 = vmax.f32 %v599_v28, 0.0  ;;  %v719_v32 = vpack.c.bf16 %v687_v29, %v687_v29 }
  0xce   : > { %v605_v31 = vpop.f32.mrf.mxu1  ;;  %v549_v34 = vpop.f32.mrf.mxu2 }
  0xcf   : > { %v704_v33 = vpack.c.bf16 %v672_v30, %v672_v30  ;;  %752 = vst.msk [vmem:[%s1240_s19 + $0x4c] sm:$0xf] %vm732_vm3, %v719_v32  ;;  %v550_v36 = vadd.f32 %v1233_v51, %v549_v34 }
  0xd0   : > { %v511_v37 = vpop.f32.mrf.mxu0 }
  0xd1   : > { %737 = vst.msk [vmem:[%s1240_s19 + $0x10] sm:$0xf] %vm732_vm3, %v704_v33  ;;  %v512_v38 = vadd.f32 %v1233_v51, %v511_v37  ;;  %v639_v39 = vadd.f32 %v638_v7, %v550_v36 }
  0xd3   : > { %v601_v40 = vadd.f32 %v600_v9, %v512_v38  ;;  %v688_v41 = vmax.f32 %v639_v39, 0.0 }
  0xd4   : > { %v650_v18 = vpop.f32.mrf.mxu3 }
  0xd5   : > { %v673_v42 = vmax.f32 %v601_v40, 0.0  ;;  %v720_v44 = vpack.c.bf16 %v688_v41, %v688_v41 }
  0xd6   : > { %v608_v43 = vpop.f32.mrf.mxu1  ;;  %v551_v46 = vpop.f32.mrf.mxu2 }
  0xd7   : > { %v705_v45 = vpack.c.bf16 %v673_v42, %v673_v42  ;;  %753 = vst.msk [vmem:[%s1240_s19 + $0x50] sm:$0xf] %vm732_vm3, %v720_v44  ;;  %v552_v47 = vadd.f32 %v1233_v51, %v551_v46 }
  0xd8   : > { %v514_v48 = vpop.f32.mrf.mxu0 }
  0xd9   : > { %738 = vst.msk [vmem:[%s1240_s19 + $0x14] sm:$0xf] %vm732_vm3, %v705_v45  ;;  %v515_v49 = vadd.f32 %v1233_v51, %v514_v48  ;;  %v641_v52 = vadd.f32 %v640_v20, %v552_v47 }
  0xdb   : > { %v604_v53 = vadd.f32 %v603_v19, %v515_v49  ;;  %v689_v54 = vmax.f32 %v641_v52, 0.0 }
  0xdc   : > { %v653_v33 = vpop.f32.mrf.mxu3 }
  0xdd   : > { %v674_v55 = vmax.f32 %v604_v53, 0.0  ;;  %v721_v57 = vpack.c.bf16 %v689_v54, %v689_v54 }
  0xde   : > { %v610_v56 = vpop.f32.mrf.mxu1  ;;  %v554_v60 = vpop.f32.mrf.mxu2 }
  0xdf   : > { %v706_v58 = vpack.c.bf16 %v674_v55, %v674_v55  ;;  %754 = vst.msk [vmem:[%s1240_s19 + $0x54] sm:$0xf] %vm732_vm3, %v721_v57  ;;  %v555_v61 = vadd.f32 %v1233_v51, %v554_v60 }
  0xe0   : > { %v516_v62 = vpop.f32.mrf.mxu0 }
  0xe1   : > { %739 = vst.msk [vmem:[%s1240_s19 + $0x18] sm:$0xf] %vm732_vm3, %v706_v58  ;;  %v517_v63 = vadd.f32 %v1233_v51, %v516_v62  ;;  %v644_v0 = vadd.f32 %v643_v35, %v555_v61 }
  0xe3   : > { %v606_v1 = vadd.f32 %v605_v31, %v517_v63  ;;  %v690_v4 = vmax.f32 %v644_v0, 0.0 }
  0xe4   : > { %v655_v48 = vpop.f32.mrf.mxu3 }
  0xe5   : > { %v675_v5 = vmax.f32 %v606_v1, 0.0  ;;  %v722_v7 = vpack.c.bf16 %v690_v4, %v690_v4 }
  0xe6   : > { %v613_v6 = vpop.f32.mrf.mxu1  ;;  %v556_v9 = vpop.f32.mrf.mxu2 }
  0xe7   : > { %v707_v8 = vpack.c.bf16 %v675_v5, %v675_v5  ;;  %755 = vst.msk [vmem:[%s1240_s19 + $0x58] sm:$0xf] %vm732_vm3, %v722_v7  ;;  %v557_v10 = vadd.f32 %v1233_v51, %v556_v9 }
  0xe8   : > { %v519_v11 = vpop.f32.mrf.mxu0 }
  0xe9   : > { %740 = vst.msk [vmem:[%s1240_s19 + $0x1c] sm:$0xf] %vm732_vm3, %v707_v8  ;;  %v520_v12 = vadd.f32 %v1233_v51, %v519_v11  ;;  %v646_v13 = vadd.f32 %v645_v50, %v557_v10 }
  0xeb   : > { %v609_v14 = vadd.f32 %v608_v43, %v520_v12  ;;  %v691_v15 = vmax.f32 %v646_v13, 0.0  ;;  %v540_v13 = vadd.f32 %v1233_v51, %v1242_v59 }
  0xec   : > { %v658_v0 = vpop.f32.mrf.mxu3 }
  0xed   : > { %v676_v16 = vmax.f32 %v609_v14, 0.0  ;;  %v723_v19 = vpack.c.bf16 %v691_v15, %v691_v15 }
  0xee   : > { %v615_v17 = vpop.f32.mrf.mxu1  ;;  %v559_v21 = vpop.f32.mrf.mxu2 }
  0xef   : > { %v708_v20 = vpack.c.bf16 %v676_v16, %v676_v16  ;;  %756 = vst.msk [vmem:[%s1240_s19 + $0x5c] sm:$0xf] %vm732_vm3, %v723_v19  ;;  %v560_v22 = vadd.f32 %v1233_v51, %v559_v21 }
  0xf0   : > { %v521_v23 = vpop.f32.mrf.mxu0 }
  0xf1   : > { %741 = vst.msk [vmem:[%s1240_s19 + $0x20] sm:$0xf] %vm732_vm3, %v708_v20  ;;  %v522_v24 = vadd.f32 %v1233_v51, %v521_v23  ;;  %v649_v25 = vadd.f32 %v648_v2, %v560_v22 }
  0xf3   : > { %v611_v26 = vadd.f32 %v610_v56, %v522_v24  ;;  %v692_v27 = vmax.f32 %v649_v25, 0.0 }
  0xf4   : > { %v660_v16 = vpop.f32.mrf.mxu3 }
  0xf5   : > { %v677_v28 = vmax.f32 %v611_v26, 0.0  ;;  %v724_v30 = vpack.c.bf16 %v692_v27, %v692_v27 }
  0xf6   : > { %v618_v29 = vpop.f32.mrf.mxu1  ;;  %v561_v32 = vpop.f32.mrf.mxu2 }
  0xf7   : > { %v709_v31 = vpack.c.bf16 %v677_v28, %v677_v28  ;;  %757 = vst.msk [vmem:[%s1240_s19 + $0x60] sm:$0xf] %vm732_vm3, %v724_v30  ;;  %v562_v34 = vadd.f32 %v1233_v51, %v561_v32  ;;  %v542_v28 = vadd.f32 %v1233_v51, %v1247_v3 }
  0xf8   : > { %v524_v35 = vpop.f32.mrf.mxu0 }
  0xf9   : > { %742 = vst.msk [vmem:[%s1240_s19 + $0x24] sm:$0xf] %vm732_vm3, %v709_v31  ;;  %v525_v36 = vadd.f32 %v1233_v51, %v524_v35  ;;  %v651_v37 = vadd.f32 %v650_v18, %v562_v34 }
  0xfb   : > { %v614_v38 = vadd.f32 %v613_v6, %v525_v36  ;;  %v693_v39 = vmax.f32 %v651_v37, 0.0 }
  0xfc   : > { %v663_v35 = vpop.f32.mrf.mxu3 }
  0xfd   : > { %v678_v40 = vmax.f32 %v614_v38, 0.0  ;;  %v725_v42 = vpack.c.bf16 %v693_v39, %v693_v39 }
  0xfe   : > { %v620_v41 = vpop.f32.mrf.mxu1  ;;  %v564_v44 = vpop.f32.mrf.mxu2 }
  0xff   : > { %v710_v43 = vpack.c.bf16 %v678_v40, %v678_v40  ;;  %758 = vst.msk [vmem:[%s1240_s19 + $0x64] sm:$0xf] %vm732_vm3, %v725_v42  ;;  %v565_v45 = vadd.f32 %v1233_v51, %v564_v44 }
 0x100   : > { %v526_v46 = vpop.f32.mrf.mxu0 }
 0x101   : > { %743 = vst.msk [vmem:[%s1240_s19 + $0x28] sm:$0xf] %vm732_vm3, %v710_v43  ;;  %v527_v47 = vadd.f32 %v1233_v51, %v526_v46  ;;  %v654_v49 = vadd.f32 %v653_v33, %v565_v45 }
 0x103   : > { %v616_v50 = vadd.f32 %v615_v17, %v527_v47  ;;  %v694_v52 = vmax.f32 %v654_v49, 0.0 }
 0x104   : > { %v665_v49 = vpop.f32.mrf.mxu3 }
 0x105   : > { %v679_v53 = vmax.f32 %v616_v50, 0.0  ;;  %v726_v55 = vpack.c.bf16 %v694_v52, %v694_v52 }
 0x106   : > { %v623_v54 = vpop.f32.mrf.mxu1  ;;  %v566_v57 = vpop.f32.mrf.mxu2 }
 0x107   : > { %v711_v56 = vpack.c.bf16 %v679_v53, %v679_v53  ;;  %759 = vst.msk [vmem:[%s1240_s19 + $0x68] sm:$0xf] %vm732_vm3, %v726_v55  ;;  %v567_v58 = vadd.f32 %v1233_v51, %v566_v57 }
 0x108   : > { %v529_v60 = vpop.f32.mrf.mxu0 }
 0x109   : > { %744 = vst.msk [vmem:[%s1240_s19 + $0x2c] sm:$0xf] %vm732_vm3, %v711_v56  ;;  %v530_v61 = vadd.f32 %v1233_v51, %v529_v60  ;;  %v656_v62 = vadd.f32 %v655_v48, %v567_v58 }
 0x10b   : > { %v619_v63 = vadd.f32 %v618_v29, %v530_v61  ;;  %v695_v1 = vmax.f32 %v656_v62, 0.0 }
 0x10d   : > { %v680_v2 = vmax.f32 %v619_v63, 0.0  ;;  %v727_v5 = vpack.c.bf16 %v695_v1, %v695_v1 }
 0x10e   : > { %v625_v4 = vpop.f32.mrf.mxu1  ;;  %v569_v7 = vpop.f32.mrf.mxu2 }
 0x10f   : > { %v712_v6 = vpack.c.bf16 %v680_v2, %v680_v2  ;;  %760 = vst.msk [vmem:[%s1240_s19 + $0x6c] sm:$0xf] %vm732_vm3, %v727_v5  ;;  %v570_v8 = vadd.f32 %v1233_v51, %v569_v7 }
 0x110   : > { %v531_v9 = vpop.f32.mrf.mxu0 }
 0x111   : > { %745 = vst.msk [vmem:[%s1240_s19 + $0x30] sm:$0xf] %vm732_vm3, %v712_v6  ;;  %v532_v10 = vadd.f32 %v1233_v51, %v531_v9  ;;  %v659_v11 = vadd.f32 %v658_v0, %v570_v8 }
 0x113   : > { %v621_v12 = vadd.f32 %v620_v41, %v532_v10  ;;  %v696_v14 = vmax.f32 %v659_v11, 0.0 }
 0x115   : > { %v681_v15 = vmax.f32 %v621_v12, 0.0  ;;  %v728_v18 = vpack.c.bf16 %v696_v14, %v696_v14 }
 0x116   : > { %v628_v17 = vpop.f32.mrf.mxu1  ;;  %v571_v21 = vpop.f32.mrf.mxu2 }
 0x117   : > { %v629_v19 = vadd.f32 %v628_v17, %v540_v13  ;;  %v713_v20 = vpack.c.bf16 %v681_v15, %v681_v15  ;;  %761 = vst.msk [vmem:[%s1240_s19 + $0x70] sm:$0xf] %vm732_vm3, %v728_v18  ;;  %v572_v23 = vadd.f32 %v1233_v51, %v571_v21 }
 0x118   : > { %v534_v24 = vpop.f32.mrf.mxu0 }
 0x119   : > { %v684_v22 = vmax.f32 %v629_v19, 0.0  ;;  %746 = vst.msk [vmem:[%s1240_s19 + $0x34] sm:$0xf] %vm732_vm3, %v713_v20  ;;  %v535_v59 = vadd.f32 %v1233_v51, %v534_v24  ;;  %v661_v26 = vadd.f32 %v660_v16, %v572_v23 }
 0x11b   : > { %v716_v25 = vpack.c.bf16 %v684_v22, %v684_v22  ;;  %v624_v27 = vadd.f32 %v623_v54, %v535_v59  ;;  %v697_v29 = vmax.f32 %v661_v26, 0.0 }
 0x11d   : > { %749 = vst.msk [vmem:[%s1240_s19 + $0x40] sm:$0xf] %vm732_vm3, %v716_v25  ;;  %v682_v30 = vmax.f32 %v624_v27, 0.0  ;;  %v729_v32 = vpack.c.bf16 %v697_v29, %v697_v29 }
 0x11e   : > { %v630_v31 = vpop.f32.mrf.mxu1  ;;  %v574_v36 = vpop.f32.mrf.mxu2 }
 0x11f   : > { %v631_v33 = vadd.f32 %v630_v31, %v542_v28  ;;  %v714_v34 = vpack.c.bf16 %v682_v30, %v682_v30  ;;  %762 = vst.msk [vmem:[%s1240_s19 + $0x74] sm:$0xf] %vm732_vm3, %v729_v32  ;;  %v575_v38 = vadd.f32 %v1233_v51, %v574_v36 }
 0x120   : > { %v536_v39 = vpop.f32.mrf.mxu0 }
 0x121   : > { %v685_v37 = vmax.f32 %v631_v33, 0.0  ;;  %747 = vst.msk [vmem:[%s1240_s19 + $0x38] sm:$0xf] %vm732_vm3, %v714_v34  ;;  %v537_v3 = vadd.f32 %v1233_v51, %v536_v39  ;;  %v664_v41 = vadd.f32 %v663_v35, %v575_v38 }
 0x123   : > { %v717_v40 = vpack.c.bf16 %v685_v37, %v685_v37  ;;  %v626_v42 = vadd.f32 %v625_v4, %v537_v3  ;;  %v698_v43 = vmax.f32 %v664_v41, 0.0 }
 0x125   : > { %750 = vst.msk [vmem:[%s1240_s19 + $0x44] sm:$0xf] %vm732_vm3, %v717_v40  ;;  %v683_v44 = vmax.f32 %v626_v42, 0.0  ;;  %v730_v45 = vpack.c.bf16 %v698_v43, %v698_v43 }
 0x126   : > { %v576_v47 = vpop.f32.mrf.mxu2 }
 0x127   : > { %v715_v46 = vpack.c.bf16 %v683_v44, %v683_v44  ;;  %763 = vst.msk [vmem:[%s1240_s19 + $0x78] sm:$0xf] %vm732_vm3, %v730_v45  ;;  %v577_v48 = vadd.f32 %v1233_v51, %v576_v47 }
 0x129   : > { %748 = vst.msk [vmem:[%s1240_s19 + $0x3c] sm:$0xf] %vm732_vm3, %v715_v46  ;;  %v666_v50 = vadd.f32 %v665_v49, %v577_v48 }
 0x12b   : > { %v699_v52 = vmax.f32 %v666_v50, 0.0 }
 0x12d   : > { %v731_v53 = vpack.c.bf16 %v699_v52, %v699_v52 }
 0x12f   : > { %764 = vst.msk [vmem:[%s1240_s19 + $0x7c] sm:$0xf] %vm732_vm3, %v731_v53 }
 0x130 PF: > { %s13_s12 = sadd.s32 1, %s1081_s12  }
 0x131   : > { %p10_p4 = scmp.ge.s32.totalorder %s13_s12, 4  }
 0x133   :  { %12 = sbr.rel (!%p10_p4) target bundleno = 1 (0x1), region = 62 }

</bundles_post_ra>
